<compile_context>
chip_gen: v7x
topology: tpu7x:2x2x1
jax: 0.10.0
libtpu: 0.0.40
codegen_flags: <defaults>
</compile_context>

<pallas_src>
import jax
import jax.numpy as jnp
from jax.experimental import pallas as pl
from jax.experimental.pallas import tpu as pltpu


def _copy_hbm_to_hbm_kernel(src_hbm_ref, dst_hbm_ref, sem):
    # Single whole-array HBM -> HBM DMA; no VMEM staging, no grid loop.
    cp = pltpu.make_async_copy(src_hbm_ref, dst_hbm_ref, sem)
    cp.start()
    cp.wait()


def estimate_feature_forward(estimated_feature):
    """Pallas implementation of EstimateFeature.forward().

    estimated_feature: (n, k) float32 parameter (already initialized to the
    input `feature` matrix, mirroring _init_estimation).
    Returns a new (n, k) float32 array identical to the parameter, produced
    by a single HBM->HBM DMA (the parameter itself is left untouched, so it
    can keep being updated by an optimizer, matching nn.Parameter semantics).
    """
    x = estimated_feature
    n, k = x.shape

    out = pl.pallas_call(
        _copy_hbm_to_hbm_kernel,
        out_shape=jax.ShapeDtypeStruct((n, k), x.dtype),
        in_specs=[pl.BlockSpec(memory_space=pl.ANY)],   # raw HBM ref, no auto-DMA
        out_specs=pl.BlockSpec(memory_space=pl.ANY),    # raw HBM ref, written by DMA
        scratch_shapes=[pltpu.SemaphoreType.DMA],
        compiler_params=pltpu.CompilerParams(has_side_effects=True),
    )(x)

    return out


class EstimateFeature:
    """JAX/Pallas counterpart of the PyTorch EstimateFeature module."""

    def __init__(self, feature):
        # _init_estimation: parameter is a copy of the provided feature matrix.
        self.estimated_feature = jnp.asarray(feature, dtype=jnp.float32)

    def __call__(self):
        return estimate_feature_forward(self.estimated_feature)


if __name__ == "__main__":
    key = jax.random.PRNGKey(0)
    # Small synthetic feature matrix: n=12 nodes, k=200 features
    # (deliberately not tile-aligned; the whole-array DMA needs no padding).
    n, k = 12, 200
    feature = jax.random.normal(key, (n, k), dtype=jnp.float32)

    module = EstimateFeature(feature)
    out = module()
    jax.block_until_ready(out)

    assert out.shape == (n, k), out.shape
    assert out.dtype == jnp.float32, out.dtype
    assert bool(jnp.allclose(out, feature)), "forward() must return the parameter"

    print("KERNEL_OK")
</pallas_src>

<mosaic_0001>
module attributes {stable_mosaic.version = 11 : i64} {
  func.func @_copy_hbm_to_hbm_kernel(%arg0: memref<12x200xf32, #tpu.memory_space<any>>, %arg1: memref<12x200xf32, #tpu.memory_space<any>>, %arg2: memref<!tpu.dma_semaphore, #tpu.memory_space<semaphore_mem>>) attributes {dimension_semantics = [], scalar_prefetch = 0 : i64, scratch_operands = 1 : i64, tpu.core_type = #tpu.core_type<tc>} {
    tpu.enqueue_dma source(%arg0 : memref<12x200xf32, #tpu.memory_space<any>>) target(%arg1 : memref<12x200xf32, #tpu.memory_space<any>>) target_semaphore(%arg2 : memref<!tpu.dma_semaphore, #tpu.memory_space<semaphore_mem>>)
    tpu.wait_dma2 semaphore(%arg2 : memref<!tpu.dma_semaphore, #tpu.memory_space<semaphore_mem>>) src(%arg0 : memref<12x200xf32, #tpu.memory_space<any>>) dst(%arg1 : memref<12x200xf32, #tpu.memory_space<any>>)
    return
  }
}

</mosaic_0001>

<bundles_post_ra>
// kernel: tpu_custom_call.1
= control target key start
LH: loop header
LB: loop body
LE: loop exit
PB: predicated region body
PF: predicated region fallthrough
CT: control target
= control target key end

     0   :  { %s35_s6 = smov [#allocation2]   ;;  %s36_s7 = smov [#allocation3]   ;;  %s54_s0 = inlined_call_operand.hbm [shape: f32[12,200], index: 0, kind: input, shape index: {}]   ;;  %s55_s1 = inlined_call_operand.hbm [shape: f32[12,200], index: 1, kind: output, shape index: {}]  }
   0x1   :  { %s37_s8 = smov 0  }
   0x2   :  { %18 = dma.general %s54_s0, 512, %s55_s1, %s35_s6, %s36_s7, [#allocation4], %s37_s8, 0  }
   0x3   :  { %33 = dma.done.wait [#allocation2], 512 }
   0x4   :  { %34 = vsyncadd [#allocation2], 4294966784 }
   0x5   :  { %23 = vsyncmov [#allocation2] }
   0x8   :  { %s24_s13 = vpop.sfrf %23 }
   0x9   :  { %p29_p0 = scmp.ne.s32.totalorder %s24_s13, 0 }
   0xb   :  { %28 = shalt.err (%p29_p0)  }

</bundles_post_ra>
